<compile_context>
chip_gen: v6e
topology: v6e:2x2x1
jax: 0.10.0
libtpu: 0.0.40
codegen_flags: <defaults>
</compile_context>

<pallas_src>
import functools
import math

import jax
import jax.numpy as jnp
from jax import lax
from jax.experimental import pallas as pl
from jax.experimental.pallas import tpu as pltpu

_HALF_LOG_2PI = 0.9189385332046727  # 0.5 * log(2*pi)
# Stirling correction series: 1/(12x) - 1/(360 x^3) + 1/(1260 x^5)
_S1 = 1.0 / 12.0
_S3 = -1.0 / 360.0
_S5 = 1.0 / 1260.0


def _lgamma_terms(z):
    """lgamma(z) = stirling - log(p), for z > 0 (vectorized, f32).

    Fixed shift-by-4 recurrence: lgamma(z) = lgamma(z+4) - log(z(z+1)(z+2)(z+3)),
    with lgamma(z+4) from a 3-term Stirling series.  The shift product `p` is
    returned un-logged so the caller can fold the three logs of
    lgamma(a)+lgamma(b)-lgamma(c) into a single EUP log.
    Cost: 1 approximate EUP reciprocal (feeds a <=0.021 correction, so approx
    error is negligible) + 1 EUP log; the rest is VPU adds/muls.
    Series truncation error ~1e-6 absolute; `p` stays below f32 overflow for
    z up to ~4e9 (theta is clamped at 1e6).
    """
    p = z * (z + 1.0) * (z + 2.0) * (z + 3.0)
    x = z + 4.0
    r = pl.reciprocal(x, approx=True)
    r2 = r * r
    series = ((_S5 * r2 + _S3) * r2 + _S1) * r
    stirling = (x - 0.5) * jnp.log(x) - x + _HALF_LOG_2PI + series
    return stirling, p


def _nb_loss_kernel(mu_ref, theta_ref, y_ref, out_ref, *, scale_factor, eps,
                    total, need_mask):
    mu = mu_ref[...].astype(jnp.float32)
    theta = jnp.minimum(theta_ref[...].astype(jnp.float32), 1.0e6)  # clamp(max=1e6)
    y = y_ref[...].astype(jnp.float32)

    y_pred = mu * scale_factor
    th_eps = theta + eps
    log_th_eps = jnp.log(th_eps)            # shared by both t2 terms

    # t1 = lgamma(th_eps) + lgamma(y+1) - lgamma(y+th_eps), with the three
    # shift-product logs folded into one EUP log:
    #   -log(p_a) - log(p_b) + log(p_c) = -log((p_a / p_c) * p_b)
    # p_a <= p_c elementwise (a <= c), so the ratio is formed FIRST to keep the
    # running product below f32 overflow (p_b alone can reach ~(y+4)^4).
    s_a, p_a = _lgamma_terms(th_eps)
    s_b, p_b = _lgamma_terms(y + 1.0)
    s_c, p_c = _lgamma_terms(y + th_eps)
    ratio = p_a * pl.reciprocal(p_c, approx=True)
    t1 = (s_a + s_b - s_c) - jnp.log(ratio * p_b)

    # t2: log1p(y_pred / th_eps) rewritten divide-free as
    #     log(th_eps + y_pred) - log(th_eps), sharing log(th_eps).
    # TODO(synk): if theta near the 1e6 clamp with y_pred << theta is a real
    # regime, switch this term to (theta+y)*log1p(y_pred*pl.reciprocal(th_eps))
    # (~1 extra EUP op/element) to avoid the log-difference cancellation.
    t2 = ((theta + y) * (jnp.log(th_eps + y_pred) - log_th_eps)
          + y * (log_th_eps - jnp.log(y_pred + eps)))

    retval = t1 + t2
    abs_mu = jnp.abs(mu)

    if need_mask:
        # Exactly zero out contributions of wrapper padding (static flag; only
        # the last tile contains padded elements).  Cheap VPU work.
        rows, cols = mu_ref.shape
        base = pl.program_id(0) * (rows * cols)
        gidx = (base
                + lax.broadcasted_iota(jnp.int32, (rows, cols), 0) * cols
                + lax.broadcasted_iota(jnp.int32, (rows, cols), 1))
        valid = gidx < total
        retval = jnp.where(valid, retval, 0.0)
        abs_mu = jnp.where(valid, abs_mu, 0.0)

    # Merged lane-dense (1, 2, cols) output block:
    #   row 0: per-lane partial sums of the NB loss terms
    #   row 1: per-lane partial sums of |mu| (global-last-row exclusion is
    #          applied in the JAX wrapper)
    out_ref[0:1, 0:1, :] = jnp.sum(retval, axis=0, keepdims=True)[None]
    out_ref[0:1, 1:2, :] = jnp.sum(abs_mu, axis=0, keepdims=True)[None]


def _hw_budget():
    """Return (max_block_elems, vmem_limit_bytes) tuned per TPU generation."""
    try:
        vmem_cap = int(pltpu.get_tpu_info().vmem_capacity_bytes)
    except Exception:
        vmem_cap = 64 * 1024 * 1024                       # conservative (v7x-sized)
    if vmem_cap >= 128 * 1024 * 1024:                     # v5e / v6e: 128 MiB VMEM
        return 2 * 1024 * 1024, 64 * 1024 * 1024
    return 512 * 1024, 32 * 1024 * 1024                   # v7x: 64 MiB VMEM per TC


def _pick_block_rows(rows, cols, max_block_elems):
    """Row tile: multiple of 8 that divides `rows`, keeps a block under
    max_block_elems, guarantees >= 2 tiles (>= 4 when rows allow) so that
    DMA/compute pipelining and megacore sharding engage, and prefers EVEN tile
    counts so the two v7x TensorCores get balanced work."""
    if rows <= 8:
        return rows
    cap = max(8, max_block_elems // max(cols, 1))
    if rows >= 32:
        cap = min(cap, rows // 4)
    elif rows >= 16:
        cap = min(cap, rows // 2)
    cap = min(cap, rows)
    cap -= cap % 8
    cap = max(cap, 8)
    best_odd = None
    t = cap
    while t >= 8:
        if rows % t == 0:
            if (rows // t) % 2 == 0:
                return t
            if best_odd is None:
                best_odd = t
        t -= 8
    return best_odd if best_odd is not None else rows


def negative_binomial_loss(preds, target, *, scale_factor=1.0, eps=1e-10,
                           l1_lambda=0.0, block_rows=None):
    """JAX/Pallas equivalent of NegativeBinomialLoss.forward (mean=True)."""
    mu, theta = preds[:2]
    mu = jnp.asarray(mu)
    theta = jnp.asarray(theta)
    target = jnp.asarray(target)
    if mu.shape != theta.shape or mu.shape != target.shape or mu.ndim < 1:
        raise ValueError("mu/theta/target must share a shape with ndim >= 1")
    total = math.prod(mu.shape)

    max_block_elems, vmem_limit = _hw_budget()

    # Lane-dense 2D layout.  Aligned 2-D inputs are used as-is (free reshape);
    # anything else is flattened + padded with neutral values (mu=0, theta=1,
    # y=0; exactly masked in-kernel) into a (rows, 128) slab.
    if mu.ndim == 2 and mu.shape[1] % 128 == 0 and 0 < mu.shape[1] <= 65536:
        cols = mu.shape[1]
    else:
        cols = 128
    rows_raw = -(-total // cols)
    rows = rows_raw if rows_raw <= 8 else (-(-rows_raw // 8)) * 8
    pad = rows * cols - total

    def to2d(x, pad_value):
        flat = x.reshape(-1)
        if pad:
            flat = jnp.concatenate(
                [flat, jnp.full((pad,), pad_value, dtype=flat.dtype)])
        return flat.reshape(rows, cols)

    mu2d, th2d, y2d = to2d(mu, 0), to2d(theta, 1), to2d(target, 0)

    if block_rows is None:
        block_rows = _pick_block_rows(rows, cols, max_block_elems)
    if rows % block_rows != 0 or not (block_rows % 8 == 0 or block_rows == rows):
        raise ValueError(f"block_rows={block_rows} incompatible with rows={rows}")
    num_tiles = rows // block_rows

    kernel = functools.partial(_nb_loss_kernel,
                               scale_factor=float(scale_factor),
                               eps=float(eps),
                               total=total,
                               need_mask=pad > 0)

    out = pl.pallas_call(
        kernel,
        out_shape=jax.ShapeDtypeStruct((num_tiles, 2, cols), jnp.float32),
        grid_spec=pltpu.PrefetchScalarGridSpec(
            num_scalar_prefetch=0,
            grid=(num_tiles,),
            in_specs=[pl.BlockSpec((block_rows, cols), lambda i: (i, 0))] * 3,
            out_specs=pl.BlockSpec((1, 2, cols), lambda i: (i, 0, 0)),
        ),
        compiler_params=pltpu.CompilerParams(
            dimension_semantics=("parallel",),
            vmem_limit_bytes=vmem_limit,
        ),
    )(mu2d, th2d, y2d)

    mean_loss = jnp.sum(out[:, 0, :]) / total              # torch.mean(retval)
    # encoded = preds[:-1]: drop the last slice along axis 0 from the |mu| sum.
    l1 = jnp.sum(out[:, 1, :]) - jnp.sum(jnp.abs(mu[-1].astype(jnp.float32)))
    return mean_loss + l1_lambda * l1


def _reference_loss(mu, theta, target, *, scale_factor=1.0, eps=1e-10,
                    l1_lambda=0.0):
    from jax.scipy.special import gammaln
    mu = mu.astype(jnp.float32)
    theta = theta.astype(jnp.float32)
    target = target.astype(jnp.float32)
    y_pred = mu * scale_factor
    th = jnp.minimum(theta, 1.0e6)
    t1 = gammaln(th + eps) + gammaln(target + 1.0) - gammaln(target + th + eps)
    t2 = ((th + target) * jnp.log1p(y_pred / (th + eps))
          + target * (jnp.log(th + eps) - jnp.log(y_pred + eps)))
    return jnp.mean(t1 + t2) + l1_lambda * jnp.sum(jnp.abs(mu[:-1]))


if __name__ == "__main__":
    key = jax.random.PRNGKey(0)

    # (B, N): first case = single tile; second case auto-tiles to a 4-step
    # "parallel" grid (exercises per-tile partial sums + wrapper L1 fix-up);
    # third case is lane-misaligned (N=200) and exercises the flatten / pad /
    # in-kernel-mask path.
    for (b, n) in ((8, 128), (32, 128), (20, 200)):
        key, k1, k2, k3 = jax.random.split(key, 4)
        mu = jax.random.uniform(k1, (b, n), jnp.float32, minval=0.1, maxval=5.0)
        theta = jax.random.uniform(k2, (b, n), jnp.float32, minval=0.5, maxval=10.0)
        target = jax.random.poisson(k3, 3.0, (b, n)).astype(jnp.float32)

        for l1_lambda in (0.0, 0.01):
            loss = negative_binomial_loss((mu, theta), target,
                                          l1_lambda=l1_lambda)
            loss = jax.block_until_ready(loss)
            ref = _reference_loss(mu, theta, target, l1_lambda=l1_lambda)
            err = abs(float(loss) - float(ref))
            tol = 1e-3 * max(1.0, abs(float(ref)))
            assert err < tol, (b, n, l1_lambda, float(loss), float(ref), err)

    print("KERNEL_OK")
</pallas_src>

<mosaic_0001>
module attributes {stable_mosaic.version = 11 : i64} {
  func.func @_nb_loss_kernel(%arg0: i32, %arg1: memref<8x128xf32, #tpu.memory_space<vmem>>, %arg2: memref<8x128xf32, #tpu.memory_space<vmem>>, %arg3: memref<8x128xf32, #tpu.memory_space<vmem>>, %arg4: memref<1x2x128xf32, #tpu.memory_space<vmem>>) attributes {dimension_semantics = [#tpu.dimension_semantics<parallel>], iteration_bounds = array<i64: 1>, scalar_prefetch = 0 : i64, scratch_operands = 0 : i64, tpu.core_type = #tpu.core_type<tc>, window_params = [{transform_indices = @transform_0, window_bounds = array<i64: 8, 128>}, {transform_indices = @transform_1, window_bounds = array<i64: 8, 128>}, {transform_indices = @transform_2, window_bounds = array<i64: 8, 128>}, {transform_indices = @transform_3, window_bounds = array<i64: 1, 2, 128>}]} {
    %c0 = arith.constant 0 : index
    %c0_0 = arith.constant 0 : index
    %0 = vector.load %arg1[%c0, %c0_0] : memref<8x128xf32, #tpu.memory_space<vmem>>, vector<8x128xf32>
    %c0_1 = arith.constant 0 : index
    %c0_2 = arith.constant 0 : index
    %1 = vector.load %arg2[%c0_1, %c0_2] : memref<8x128xf32, #tpu.memory_space<vmem>>, vector<8x128xf32>
    %cst = arith.constant 1.000000e+06 : f32
    %2 = vector.broadcast %cst : f32 to vector<8x128xf32>
    %3 = arith.minimumf %1, %2 : vector<8x128xf32>
    %c0_3 = arith.constant 0 : index
    %c0_4 = arith.constant 0 : index
    %4 = vector.load %arg3[%c0_3, %c0_4] : memref<8x128xf32, #tpu.memory_space<vmem>>, vector<8x128xf32>
    %cst_5 = arith.constant 1.000000e+00 : f32
    %5 = vector.broadcast %cst_5 : f32 to vector<8x128xf32>
    %6 = arith.mulf %0, %5 : vector<8x128xf32>
    %cst_6 = arith.constant 1.000000e-10 : f32
    %7 = vector.broadcast %cst_6 : f32 to vector<8x128xf32>
    %8 = arith.addf %3, %7 : vector<8x128xf32>
    %9 = math.log %8 : vector<8x128xf32>
    %cst_7 = arith.constant 1.000000e+00 : f32
    %10 = vector.broadcast %cst_7 : f32 to vector<8x128xf32>
    %11 = arith.addf %8, %10 : vector<8x128xf32>
    %12 = arith.mulf %8, %11 : vector<8x128xf32>
    %cst_8 = arith.constant 2.000000e+00 : f32
    %13 = vector.broadcast %cst_8 : f32 to vector<8x128xf32>
    %14 = arith.addf %8, %13 : vector<8x128xf32>
    %15 = arith.mulf %12, %14 : vector<8x128xf32>
    %cst_9 = arith.constant 3.000000e+00 : f32
    %16 = vector.broadcast %cst_9 : f32 to vector<8x128xf32>
    %17 = arith.addf %8, %16 : vector<8x128xf32>
    %18 = arith.mulf %15, %17 : vector<8x128xf32>
    %cst_10 = arith.constant 4.000000e+00 : f32
    %19 = vector.broadcast %cst_10 : f32 to vector<8x128xf32>
    %20 = arith.addf %8, %19 : vector<8x128xf32>
    %21 = tpu.reciprocal %20 {approx = true} : vector<8x128xf32> -> vector<8x128xf32>
    %22 = arith.mulf %21, %21 : vector<8x128xf32>
    %cst_11 = arith.constant 7.93650805E-4 : f32
    %23 = vector.broadcast %cst_11 : f32 to vector<8x128xf32>
    %24 = arith.mulf %23, %22 : vector<8x128xf32>
    %cst_12 = arith.constant -0.00277777785 : f32
    %25 = vector.broadcast %cst_12 : f32 to vector<8x128xf32>
    %26 = arith.addf %24, %25 : vector<8x128xf32>
    %27 = arith.mulf %26, %22 : vector<8x128xf32>
    %cst_13 = arith.constant 0.0833333358 : f32
    %28 = vector.broadcast %cst_13 : f32 to vector<8x128xf32>
    %29 = arith.addf %27, %28 : vector<8x128xf32>
    %30 = arith.mulf %29, %21 : vector<8x128xf32>
    %cst_14 = arith.constant 5.000000e-01 : f32
    %31 = vector.broadcast %cst_14 : f32 to vector<8x128xf32>
    %32 = arith.subf %20, %31 : vector<8x128xf32>
    %33 = math.log %20 : vector<8x128xf32>
    %34 = arith.mulf %32, %33 : vector<8x128xf32>
    %35 = arith.subf %34, %20 : vector<8x128xf32>
    %cst_15 = arith.constant 0.918938517 : f32
    %36 = vector.broadcast %cst_15 : f32 to vector<8x128xf32>
    %37 = arith.addf %35, %36 : vector<8x128xf32>
    %38 = arith.addf %37, %30 : vector<8x128xf32>
    %cst_16 = arith.constant 1.000000e+00 : f32
    %39 = vector.broadcast %cst_16 : f32 to vector<8x128xf32>
    %40 = arith.addf %4, %39 : vector<8x128xf32>
    %cst_17 = arith.constant 1.000000e+00 : f32
    %41 = vector.broadcast %cst_17 : f32 to vector<8x128xf32>
    %42 = arith.addf %40, %41 : vector<8x128xf32>
    %43 = arith.mulf %40, %42 : vector<8x128xf32>
    %cst_18 = arith.constant 2.000000e+00 : f32
    %44 = vector.broadcast %cst_18 : f32 to vector<8x128xf32>
    %45 = arith.addf %40, %44 : vector<8x128xf32>
    %46 = arith.mulf %43, %45 : vector<8x128xf32>
    %cst_19 = arith.constant 3.000000e+00 : f32
    %47 = vector.broadcast %cst_19 : f32 to vector<8x128xf32>
    %48 = arith.addf %40, %47 : vector<8x128xf32>
    %49 = arith.mulf %46, %48 : vector<8x128xf32>
    %cst_20 = arith.constant 4.000000e+00 : f32
    %50 = vector.broadcast %cst_20 : f32 to vector<8x128xf32>
    %51 = arith.addf %40, %50 : vector<8x128xf32>
    %52 = tpu.reciprocal %51 {approx = true} : vector<8x128xf32> -> vector<8x128xf32>
    %53 = arith.mulf %52, %52 : vector<8x128xf32>
    %cst_21 = arith.constant 7.93650805E-4 : f32
    %54 = vector.broadcast %cst_21 : f32 to vector<8x128xf32>
    %55 = arith.mulf %54, %53 : vector<8x128xf32>
    %cst_22 = arith.constant -0.00277777785 : f32
    %56 = vector.broadcast %cst_22 : f32 to vector<8x128xf32>
    %57 = arith.addf %55, %56 : vector<8x128xf32>
    %58 = arith.mulf %57, %53 : vector<8x128xf32>
    %cst_23 = arith.constant 0.0833333358 : f32
    %59 = vector.broadcast %cst_23 : f32 to vector<8x128xf32>
    %60 = arith.addf %58, %59 : vector<8x128xf32>
    %61 = arith.mulf %60, %52 : vector<8x128xf32>
    %cst_24 = arith.constant 5.000000e-01 : f32
    %62 = vector.broadcast %cst_24 : f32 to vector<8x128xf32>
    %63 = arith.subf %51, %62 : vector<8x128xf32>
    %64 = math.log %51 : vector<8x128xf32>
    %65 = arith.mulf %63, %64 : vector<8x128xf32>
    %66 = arith.subf %65, %51 : vector<8x128xf32>
    %cst_25 = arith.constant 0.918938517 : f32
    %67 = vector.broadcast %cst_25 : f32 to vector<8x128xf32>
    %68 = arith.addf %66, %67 : vector<8x128xf32>
    %69 = arith.addf %68, %61 : vector<8x128xf32>
    %70 = arith.addf %4, %8 : vector<8x128xf32>
    %cst_26 = arith.constant 1.000000e+00 : f32
    %71 = vector.broadcast %cst_26 : f32 to vector<8x128xf32>
    %72 = arith.addf %70, %71 : vector<8x128xf32>
    %73 = arith.mulf %70, %72 : vector<8x128xf32>
    %cst_27 = arith.constant 2.000000e+00 : f32
    %74 = vector.broadcast %cst_27 : f32 to vector<8x128xf32>
    %75 = arith.addf %70, %74 : vector<8x128xf32>
    %76 = arith.mulf %73, %75 : vector<8x128xf32>
    %cst_28 = arith.constant 3.000000e+00 : f32
    %77 = vector.broadcast %cst_28 : f32 to vector<8x128xf32>
    %78 = arith.addf %70, %77 : vector<8x128xf32>
    %79 = arith.mulf %76, %78 : vector<8x128xf32>
    %cst_29 = arith.constant 4.000000e+00 : f32
    %80 = vector.broadcast %cst_29 : f32 to vector<8x128xf32>
    %81 = arith.addf %70, %80 : vector<8x128xf32>
    %82 = tpu.reciprocal %81 {approx = true} : vector<8x128xf32> -> vector<8x128xf32>
    %83 = arith.mulf %82, %82 : vector<8x128xf32>
    %cst_30 = arith.constant 7.93650805E-4 : f32
    %84 = vector.broadcast %cst_30 : f32 to vector<8x128xf32>
    %85 = arith.mulf %84, %83 : vector<8x128xf32>
    %cst_31 = arith.constant -0.00277777785 : f32
    %86 = vector.broadcast %cst_31 : f32 to vector<8x128xf32>
    %87 = arith.addf %85, %86 : vector<8x128xf32>
    %88 = arith.mulf %87, %83 : vector<8x128xf32>
    %cst_32 = arith.constant 0.0833333358 : f32
    %89 = vector.broadcast %cst_32 : f32 to vector<8x128xf32>
    %90 = arith.addf %88, %89 : vector<8x128xf32>
    %91 = arith.mulf %90, %82 : vector<8x128xf32>
    %cst_33 = arith.constant 5.000000e-01 : f32
    %92 = vector.broadcast %cst_33 : f32 to vector<8x128xf32>
    %93 = arith.subf %81, %92 : vector<8x128xf32>
    %94 = math.log %81 : vector<8x128xf32>
    %95 = arith.mulf %93, %94 : vector<8x128xf32>
    %96 = arith.subf %95, %81 : vector<8x128xf32>
    %cst_34 = arith.constant 0.918938517 : f32
    %97 = vector.broadcast %cst_34 : f32 to vector<8x128xf32>
    %98 = arith.addf %96, %97 : vector<8x128xf32>
    %99 = arith.addf %98, %91 : vector<8x128xf32>
    %100 = tpu.reciprocal %79 {approx = true} : vector<8x128xf32> -> vector<8x128xf32>
    %101 = arith.mulf %18, %100 : vector<8x128xf32>
    %102 = arith.addf %38, %69 : vector<8x128xf32>
    %103 = arith.subf %102, %99 : vector<8x128xf32>
    %104 = arith.mulf %101, %49 : vector<8x128xf32>
    %105 = math.log %104 : vector<8x128xf32>
    %106 = arith.subf %103, %105 : vector<8x128xf32>
    %107 = arith.addf %3, %4 : vector<8x128xf32>
    %108 = arith.addf %8, %6 : vector<8x128xf32>
    %109 = math.log %108 : vector<8x128xf32>
    %110 = arith.subf %109, %9 : vector<8x128xf32>
    %111 = arith.mulf %107, %110 : vector<8x128xf32>
    %cst_35 = arith.constant 1.000000e-10 : f32
    %112 = vector.broadcast %cst_35 : f32 to vector<8x128xf32>
    %113 = arith.addf %6, %112 : vector<8x128xf32>
    %114 = math.log %113 : vector<8x128xf32>
    %115 = arith.subf %9, %114 : vector<8x128xf32>
    %116 = arith.mulf %4, %115 : vector<8x128xf32>
    %117 = arith.addf %111, %116 : vector<8x128xf32>
    %118 = arith.addf %106, %117 : vector<8x128xf32>
    %119 = math.absf %0 : vector<8x128xf32>
    %cst_36 = arith.constant dense<0.000000e+00> : vector<128xf32>
    %120 = vector.multi_reduction <add>, %118, %cst_36 [0] : vector<8x128xf32> to vector<128xf32>
    %121 = vector.shape_cast %120 : vector<128xf32> to vector<1x128xf32>
    %122 = vector.shape_cast %121 : vector<1x128xf32> to vector<1x1x128xf32>
    %c0_37 = arith.constant 0 : index
    %c0_38 = arith.constant 0 : index
    %c0_39 = arith.constant 0 : index
    %123 = vector.load %arg4[%c0_37, %c0_38, %c0_39] : memref<1x2x128xf32, #tpu.memory_space<vmem>>, vector<1x1x128xf32>
    tpu.vector_store %arg4[%c0_37, %c0_38, %c0_39], %122 {strides = array<i32>} : memref<1x2x128xf32, #tpu.memory_space<vmem>>, vector<1x1x128xf32>,
    %cst_40 = arith.constant dense<0.000000e+00> : vector<128xf32>
    %124 = vector.multi_reduction <add>, %119, %cst_40 [0] : vector<8x128xf32> to vector<128xf32>
    %125 = vector.shape_cast %124 : vector<128xf32> to vector<1x128xf32>
    %126 = vector.shape_cast %125 : vector<1x128xf32> to vector<1x1x128xf32>
    %c0_41 = arith.constant 0 : index
    %c1 = arith.constant 1 : index
    %c0_42 = arith.constant 0 : index
    %127 = vector.load %arg4[%c0_41, %c1, %c0_42] : memref<1x2x128xf32, #tpu.memory_space<vmem>>, vector<1x1x128xf32>
    tpu.vector_store %arg4[%c0_41, %c1, %c0_42], %126 {strides = array<i32>} : memref<1x2x128xf32, #tpu.memory_space<vmem>>, vector<1x1x128xf32>,
    return
  }
  func.func @transform_0(%arg0: i32) -> (i32, i32) {
    %c0_i32 = arith.constant 0 : i32
    %c0_i32_0 = arith.constant 0 : i32
    return %arg0, %c0_i32 : i32, i32
  }
  func.func @transform_1(%arg0: i32) -> (i32, i32) {
    %c0_i32 = arith.constant 0 : i32
    %c0_i32_0 = arith.constant 0 : i32
    return %arg0, %c0_i32 : i32, i32
  }
  func.func @transform_2(%arg0: i32) -> (i32, i32) {
    %c0_i32 = arith.constant 0 : i32
    %c0_i32_0 = arith.constant 0 : i32
    return %arg0, %c0_i32 : i32, i32
  }
  func.func @transform_3(%arg0: i32) -> (i32, i32, i32) {
    %c0_i32 = arith.constant 0 : i32
    %c0_i32_0 = arith.constant 0 : i32
    %c0_i32_1 = arith.constant 0 : i32
    return %arg0, %c0_i32, %c0_i32_0 : i32, i32, i32
  }
}

</mosaic_0001>

<bundles_post_ra>
// kernel: tpu_custom_call.1
= control target key start
LH: loop header
LB: loop body
LE: loop exit
PB: predicated region body
PF: predicated region fallthrough
CT: control target
= control target key end

     0   :  { %8 = vsyncpa [#allocation3], 0  ;;  %s356_s0 = inlined_call_operand.hbm [shape: f32[8,128], index: 0, kind: input, shape index: {}]   ;;  %s357_s1 = inlined_call_operand.hbm [shape: f32[8,128], index: 1, kind: input, shape index: {}]   ;;  %s358_s2 = inlined_call_operand.hbm [shape: f32[8,128], index: 2, kind: input, shape index: {}]   ;;  %s359_s3 = inlined_call_operand.hbm [shape: f32[1,2,128], index: 3, kind: output, shape index: {}]  }
   0x1   :  { %9 = vsyncpa [#allocation6], 0 }
   0x2   :  { %10 = vsyncpa [#allocation4], 0  ;;  %s289_s12 = smov [#allocation5]   ;;  %s290_s14 = smov [#allocation2]  }
   0x3   :  { %s27_s13 = sshll.u32 %s289_s12, 4  ;;  %s17_s15 = sshll.u32 %s290_s14, 4  ;;  %s28_s13 = int_to_ptr.vmem [resolvable:$true] %s27_s13  ;;  %s18_s15 = int_to_ptr.vmem [resolvable:$true] %s17_s15 }
   0x4   :  { %s211_s16 = scalar_lea.vmem %s28_s13, 128  ;;  %p216_p1 = scmp.lt.s32.totalorder %s28_s13, %s28_s13 }
   0x5   :  { %p212_p0 = scmp.ne.s32.totalorder %s28_s13, %s211_s16  ;;  %p217_p2 = scmp.lt.s32.totalorder %s211_s16, %s211_s16 }
   0x7   :  { %p218_p3 = por %p217_p2, %p216_p1 }
   0x9   :  { %p219_p4 = pnand %p218_p3, %p212_p0 }
   0xb   :  { %222 = shalt.err (!%p219_p4)
}
   0xc   :  { %30 = dma.hbm_to_vmem [thread:$0]  %s357_s1, 128, %s28_s13, [#allocation6]  }
   0xd   :  { %s231_s19 = scalar_lea.vmem %s18_s15, 128  ;;  %p236_p6 = scmp.lt.s32.totalorder %s18_s15, %s18_s15 }
   0xe   :  { %p232_p5 = scmp.ne.s32.totalorder %s18_s15, %s231_s19  ;;  %p237_p7 = scmp.lt.s32.totalorder %s231_s19, %s231_s19 }
  0x10   :  { %p238_p8 = por %p237_p7, %p236_p6 }
  0x12   :  { %p239_p9 = pnand %p238_p8, %p232_p5 }
  0x14   :  { %242 = shalt.err (!%p239_p9)
}
  0x15   :  { %20 = dma.hbm_to_vmem [thread:$0]  %s356_s0, 128, %s18_s15, [#allocation3]  }
  0x16   :  { %s291_s22 = smov [#allocation7]  }
  0x17   :  { %s37_s23 = sshll.u32 %s291_s22, 4  ;;  %s38_s23 = int_to_ptr.vmem [resolvable:$true] %s37_s23 }
  0x18   :  { %s251_s24 = scalar_lea.vmem %s38_s23, 128  ;;  %p256_p11 = scmp.lt.s32.totalorder %s38_s23, %s38_s23 }
  0x19   :  { %p252_p10 = scmp.ne.s32.totalorder %s38_s23, %s251_s24  ;;  %p257_p12 = scmp.lt.s32.totalorder %s251_s24, %s251_s24 }
  0x1b   :  { %p258_p13 = por %p257_p12, %p256_p11 }
  0x1d   :  { %p259_p0 = pnand %p258_p13, %p252_p10 }
  0x1f   :  { %262 = shalt.err (!%p259_p0)
}
  0x20   :  { %40 = dma.hbm_to_vmem [thread:$0]  %s358_s2, 128, %s38_s23, [#allocation6]  }
  0x21   :  { %283 = dma.done.wait [#allocation3], 128  }
  0x22   :  { %284 = vsyncadd [#allocation3], 4294967168 }
  0x23   :  { %285 = dma.done.wait [#allocation6], 256  }
  0x24   :  { %286 = vsyncadd [#allocation6], 4294967040  ;;  %v322_v0 = vld [vmem:[#allocation5] sm:$0xff]  ;;  %v324_v1 = vld [vmem:[#allocation7] sm:$0xff]  ;;  %s292_s0 = smov [#allocation8]  }
  0x25   :  { %v50_v2 = vld [vmem:[#allocation2] sm:$0xff]  ;;  %v52_v3 = vmin.f32 %v322_v0, 1000000.0  ;;  %v78_v4 = vadd.f32 1.0, %v324_v1  ;;  %s164_s2 = sshll.u32 %s292_s0, 4  ;;  %s165_s2 = int_to_ptr.vmem [resolvable:$true] %s164_s2 }
  0x26   :  { %v143_v5 = vand.u32 2147483647, %v50_v2  ;;  %v136_v22 = vadd.f32 1e-10, %v50_v2  ;;  %s263_s26 = scalar_lea.vmem %s165_s2, 32  ;;  %p268_p2 = scmp.lt.s32.totalorder %s165_s2, %s165_s2 }
  0x27   :  { %v54_v6 = vadd.f32 1e-10, %v52_v3  ;;  %v330_v7 = vadd.f32 4.0, %v78_v4  ;;  %v79_v24 = vadd.f32 1.0, %v78_v4  ;;  %v81_v31 = vadd.f32 2.0, %v78_v4  ;;  %p264_p1 = scmp.ne.s32.totalorder %s165_s2, %s263_s26  ;;  %p269_p3 = scmp.lt.s32.totalorder %s263_s26, %s263_s26 }
  0x28   :  { %v151_v8 = vrot.slane %v143_v5, 4  ;;  %v83_v48 = vadd.f32 3.0, %v78_v4 }
  0x29   :  { %v332_v9 = vadd.f32 4.0, %v54_v6  ;;  %181 = vrcp.f32 %v330_v7  ;;  %v100_v10 = vadd.f32 %v54_v6, %v324_v1  ;;  %v57_v20 = vadd.f32 1.0, %v54_v6  ;;  %p270_p4 = por %p269_p3, %p268_p2 }
  0x2a   :  { %183 = vlog2.f32 %v330_v7  ;;  %v152_v11 = vadd.f32 %v151_v8, %v143_v5  ;;  %v131_v25 = vadd.f32 %v54_v6, %v50_v2  ;;  %v59_v29 = vadd.f32 2.0, %v54_v6 }
  0x2b   :  { %185 = vrcp.f32 %v332_v9  ;;  %v101_v12 = vadd.f32 1.0, %v100_v10  ;;  %v103_v13 = vadd.f32 2.0, %v100_v10  ;;  %v339_v14 = vadd.f32 4.0, %v100_v10  ;;  %p271_p5 = pnand %p270_p4, %p264_p1 }
  0x2c   :  { %187 = vlog2.f32 %v332_v9  ;;  %v105_v16 = vadd.f32 3.0, %v100_v10  ;;  %v153_v17 = vrot.slane %v152_v11, 2  ;;  %v58_v28 = vmul.f32 %v57_v20, %v54_v6 }
  0x2d   :  { %v102_v15 = vmul.f32 %v101_v12, %v100_v10  ;;  %189 = vrcp.f32 %v339_v14  ;;  %v80_v34 = vmul.f32 %v79_v24, %v78_v4  ;;  %v175_v35 = vadd.f32 -0.5, %v330_v7 }
  0x2e   :  { %191 = vlog2.f32 %v339_v14  ;;  %v154_v19 = vadd.f32 %v153_v17, %v152_v11  ;;  %v174_v39 = vadd.f32 -0.5, %v332_v9  ;;  %v60_v41 = vmul.f32 %v59_v29, %v58_v28 }
  0x2f   :  { %v104_v18 = vmul.f32 %v103_v13, %v102_v15  ;;  %v61_v42 = vadd.f32 3.0, %v54_v6  ;;  %v82_v47 = vmul.f32 %v81_v31, %v80_v34  ;;  %v176_v56 = vadd.f32 -0.5, %v339_v14 }
  0x30   :  { %v155_v23 = vrot.slane %v154_v19, 1  ;;  %v130_v28 = vadd.f32 %v324_v1, %v52_v3 }
  0x31   :  { %v106_v21 = vmul.f32 %v105_v16, %v104_v18  ;;  %v62_v55 = vmul.f32 %v61_v42, %v60_v41  ;;  %v84_v60 = vmul.f32 %v83_v48, %v82_v47 }
  0x32   :  { %v156_v26 = vadd.f32 %v155_v23, %v154_v19 }
  0x33   :  { %193 = vrcp.f32 %v106_v21 }
  0x34   :  { %195 = vlog2.f32 %v136_v22  ;;  %157 = vst [vmem:[#allocation8 + $0x1] sm:$0x1] %v156_v26 }
  0x35   :  { %197 = vlog2.f32 %v54_v6 }
  0x36   :  { %v182_v27 = vpop.eup %181  ;;  %199 = vlog2.f32 %v131_v25 }
  0x37   :  { %v184_v30 = vpop.eup %183  ;;  %v87_v32 = vmul.f32 %v182_v27, %v182_v27 }
  0x38   :  { %v186_v33 = vpop.eup %185  ;;  %v95_v36 = vmul.f32 0.6931472, %v184_v30 }
  0x39   :  { %v188_v37 = vpop.eup %187  ;;  %v65_v38 = vmul.f32 %v186_v33, %v186_v33  ;;  %v88_v40 = vmul.f32 0.0007936508, %v87_v32 }
  0x3a   :  { %v73_v43 = vmul.f32 0.6931472, %v188_v37  ;;  %v190_v46 = vpop.eup %189  ;;  %v96_v49 = vmul.f32 %v175_v35, %v95_v36 }
  0x3b   :  { %v66_v44 = vmul.f32 0.0007936508, %v65_v38  ;;  %v89_v45 = vadd.f32 -0.0027777778, %v88_v40  ;;  %v192_v50 = vpop.eup %191  ;;  %v109_v54 = vmul.f32 %v190_v46, %v190_v46 }
  0x3c   :  { %v74_v52 = vmul.f32 %v174_v39, %v73_v43  ;;  %v117_v57 = vmul.f32 0.6931472, %v192_v50  ;;  %v97_v2 = vsub.f32 %v96_v49, %v330_v7 }
  0x3d   :  { %v67_v51 = vadd.f32 -0.0027777778, %v66_v44  ;;  %v90_v53 = vmul.f32 %v89_v45, %v87_v32  ;;  %v110_v59 = vmul.f32 0.0007936508, %v109_v54 }
  0x3e   :  { %v75_v62 = vsub.f32 %v74_v52, %v332_v9  ;;  %v118_v6 = vmul.f32 %v176_v56, %v117_v57  ;;  %v98_v18 = vadd.f32 0.9189385, %v97_v2 }
  0x3f   :  { %v68_v58 = vmul.f32 %v67_v51, %v65_v38  ;;  %v91_v63 = vadd.f32 0.083333336, %v90_v53  ;;  %v111_v4 = vadd.f32 -0.0027777778, %v110_v59 }
  0x40   :  { %v194_v61 = vpop.eup %193  ;;  %v76_v16 = vadd.f32 0.9189385, %v75_v62  ;;  %v119_v21 = vsub.f32 %v118_v6, %v339_v14 }
  0x41   :  { %v69_v5 = vadd.f32 0.083333336, %v68_v58  ;;  %v123_v8 = vmul.f32 %v194_v61, %v62_v55  ;;  %v196_v10 = vpop.eup %195  ;;  %v112_v11 = vmul.f32 %v111_v4, %v109_v54  ;;  %v92_v17 = vmul.f32 %v182_v27, %v91_v63 }
  0x42   :  { %v198_v12 = vpop.eup %197  ;;  %v138_v7 = vmul.f32 0.6931472, %v196_v10  ;;  %v120_v26 = vadd.f32 0.9189385, %v119_v21 }
  0x43   :  { %v126_v13 = vmul.f32 %v123_v8, %v84_v60  ;;  %v200_v15 = vpop.eup %199  ;;  %v70_v19 = vmul.f32 %v186_v33, %v69_v5  ;;  %v113_v20 = vadd.f32 0.083333336, %v112_v11  ;;  %v56_v9 = vmul.f32 0.6931472, %v198_v12 }
  0x44   :  { %v133_v22 = vmul.f32 0.6931472, %v200_v15  ;;  %v99_v24 = vadd.f32 %v98_v18, %v92_v17 }
  0x45   :  { %201 = vlog2.f32 %v126_v13  ;;  %v77_v23 = vadd.f32 %v76_v16, %v70_v19  ;;  %v114_v25 = vmul.f32 %v190_v46, %v113_v20  ;;  %v139_v30 = vsub.f32 %v56_v9, %v138_v7 }
  0x46   :  { %v134_v29 = vsub.f32 %v133_v22, %v56_v9 }
  0x47   :  { %v121_v27 = vadd.f32 %v120_v26, %v114_v25  ;;  %v124_v31 = vadd.f32 %v99_v24, %v77_v23  ;;  %v140_v33 = vmul.f32 %v139_v30, %v324_v1 }
  0x48   :  { %v135_v32 = vmul.f32 %v134_v29, %v130_v28 }
  0x49   :  { %v125_v14 = vsub.f32 %v124_v31, %v121_v27 }
  0x4a   :  { %v141_v36 = vadd.f32 %v140_v33, %v135_v32 }
  0x52   :  { %v202_v34 = vpop.eup %201 }
  0x53   :  { %v128_v35 = vmul.f32 0.6931472, %v202_v34 }
  0x55   :  { %v129_v37 = vsub.f32 %v125_v14, %v128_v35 }
  0x57   :  { %v142_v38 = vadd.f32 %v141_v36, %v129_v37 }
  0x59   :  { %v144_v39 = vrot.slane %v142_v38, 4 }
  0x5b   :  { %v145_v40 = vadd.f32 %v144_v39, %v142_v38 }
  0x5d   :  { %v146_v41 = vrot.slane %v145_v40, 2 }
  0x5f   :  { %v147_v42 = vadd.f32 %v146_v41, %v145_v40 }
  0x61   :  { %v148_v0 = vrot.slane %v147_v42, 1 }
  0x63   :  { %v149_v3 = vadd.f32 %v148_v0, %v147_v42 }
  0x65   :  { %150 = vst [vmem:[#allocation8] sm:$0x1] %v149_v3 }
  0x66   :  { %274 = shalt.err (!%p271_p5)
}
  0x67   :  { %167 = dma.vmem_to_hbm [thread:$0]  %s165_s2, 32, %s359_s3, [#allocation4]  }
  0x68   :  { %287 = dma.done.wait [#allocation4], 32  }
  0x69   :  { %288 = vsyncadd [#allocation4], 4294967264 }
  0x6a   :  { %171 = vsyncpa [#allocation3], 1 }
  0x6b   :  { %172 = vsyncpa [#allocation6], 1 }
  0x6c   :  { %173 = vsyncpa [#allocation4], 1 }

</bundles_post_ra>
